<compile_context>
chip_gen: v7x
topology: tpu7x:2x2x1
jax: 0.10.0
libtpu: 0.0.40
codegen_flags: <defaults>
</compile_context>

<pallas_src>
import jax
import jax.numpy as jnp
from jax.experimental import pallas as pl
from jax.experimental.pallas import tpu as pltpu


def _make_input_layer_kernel(bt, n, d):
    def kernel(patches_ref, w_ref, table_ref, out_ref):
        # patches_ref: (bt, N, K)   bf16 flattened patches (feature order c,ph,pw)
        # w_ref:       (K, D)       bf16 conv weight, reshaped
        # table_ref:   (N+1, D)     f32: row0 = cls+pos0, rows 1.. = bias+pos
        # out_ref:     (bt, N+1, D) f32
        k = patches_ref.shape[-1]
        if bt == 1:
            p = patches_ref[0]                               # (N, K)
        else:
            p = patches_ref[...].reshape(bt * n, k)          # sublane-aligned merge
        emb = jnp.dot(p, w_ref[...],
                      preferred_element_type=jnp.float32)    # (bt*N, D) on MXU, f32 acc
        emb = emb.reshape(bt, n, d) + table_ref[pl.ds(1, n), :]
        out_ref[:, pl.ds(1, n), :] = emb.astype(out_ref.dtype)
        cls_row = jnp.broadcast_to(table_ref[pl.ds(0, 1), :], (bt, 1, d))
        out_ref[:, pl.ds(0, 1), :] = cls_row.astype(out_ref.dtype)
    return kernel


def input_layer_forward(x, conv_w, conv_b, cls_token, pos_embed, patch_size,
                        block_batch=None):
    """x: (B, C, H, W) float32 (NCHW, same as PyTorch)."""
    B, C, H, W = x.shape
    P = patch_size
    Hp, Wp = H // P, W // P
    N = Hp * Wp
    D = conv_w.shape[0]
    K = C * P * P

    # --- glue: bf16 cast + non-overlapping patch extraction, order (c, ph, pw) ---
    xb = x.astype(jnp.bfloat16)
    patches = xb.reshape(B, C, Hp, P, Wp, P)
    patches = patches.transpose(0, 2, 4, 1, 3, 5).reshape(B, N, K)

    # conv weight (D, C, P, P) -> (K, D): emb[n, d] = sum_k patch[n, k] * w[k, d]
    w_mat = conv_w.reshape(D, K).T.astype(jnp.bfloat16)

    # Pre-fold cls token, conv bias and positional embedding into one f32 table.
    pos = pos_embed.reshape(N + 1, D).astype(jnp.float32)
    table = jnp.concatenate(
        [cls_token.reshape(1, D).astype(jnp.float32) + pos[0:1],
         conv_b.reshape(1, D).astype(jnp.float32) + pos[1:]],
        axis=0)

    # Images per grid step: only merge batches when the (bt, N, K)->(bt*N, K)
    # reshape is layout-free (N sublane-aligned), and keep >= 2 grid steps so
    # the "parallel" batch axis can still be split across TensorCores.
    if block_batch is None:
        bt = 1
        if N % 8 == 0:
            for cand in (8, 4, 2):
                if B % cand == 0 and B // cand >= 2:
                    bt = cand
                    break
    else:
        bt = block_batch
    assert B % bt == 0, "block_batch must divide the batch size"

    kernel = _make_input_layer_kernel(bt, N, D)
    out = pl.pallas_call(
        kernel,
        out_shape=jax.ShapeDtypeStruct((B, N + 1, D), x.dtype),
        grid_spec=pltpu.PrefetchScalarGridSpec(
            num_scalar_prefetch=0,
            grid=(B // bt,),
            in_specs=[
                pl.BlockSpec((bt, N, K), lambda b: (b, 0, 0)),
                pl.BlockSpec((K, D), lambda b: (0, 0)),        # grid-invariant
                pl.BlockSpec((N + 1, D), lambda b: (0, 0)),    # grid-invariant
            ],
            out_specs=pl.BlockSpec((bt, N + 1, D), lambda b: (b, 0, 0)),
        ),
        compiler_params=pltpu.CompilerParams(
            dimension_semantics=("parallel",)),
    )(patches, w_mat, table)
    return out


def _reference_forward(x, conv_w, conv_b, cls_token, pos_embed, patch_size):
    """Pure-JAX f32 reference reproducing the PyTorch forward."""
    B, C, H, W = x.shape
    P = patch_size
    Hp, Wp = H // P, W // P
    N = Hp * Wp
    D = conv_w.shape[0]
    patches = x.reshape(B, C, Hp, P, Wp, P).transpose(0, 2, 4, 1, 3, 5)
    patches = patches.reshape(B, N, C * P * P)
    emb = jnp.einsum("bnk,dk->bnd", patches, conv_w.reshape(D, C * P * P)) + conv_b
    cls = jnp.broadcast_to(cls_token.reshape(1, 1, D), (B, 1, D))
    return jnp.concatenate([cls, emb], axis=1) + pos_embed.reshape(1, N + 1, D)


if __name__ == "__main__":
    # Small, module-consistent shapes (batch=4 exercises the 2-images-per-step path).
    batch = 4
    in_channels = 4
    embed_dim = 32
    patch_size = 4
    image_size = 16
    nb_patch = (image_size // patch_size) ** 2

    key = jax.random.PRNGKey(0)
    kx, kw, kb, kc, kp = jax.random.split(key, 5)

    x = jax.random.normal(kx, (batch, in_channels, image_size, image_size), jnp.float32)
    conv_w = jax.random.normal(
        kw, (embed_dim, in_channels, patch_size, patch_size), jnp.float32) * 0.02
    conv_b = jax.random.normal(kb, (embed_dim,), jnp.float32) * 0.02
    cls_token = jax.random.normal(kc, (1, 1, embed_dim), jnp.float32)
    pos_embed = jax.random.normal(kp, (1, nb_patch + 1, embed_dim), jnp.float32)

    out = input_layer_forward(x, conv_w, conv_b, cls_token, pos_embed, patch_size)
    out = jax.block_until_ready(out)

    ref = _reference_forward(x, conv_w, conv_b, cls_token, pos_embed, patch_size)
    assert out.shape == (batch, nb_patch + 1, embed_dim)
    # Tolerance loosened for the bf16 matmul operands (f32 accumulation).
    assert jnp.allclose(out, ref, atol=1e-2, rtol=1e-2)

    print("KERNEL_OK")
</pallas_src>

<mosaic_0001>
module attributes {stable_mosaic.version = 11 : i64} {
  func.func @kernel(%arg0: i32, %arg1: memref<2x16x64xbf16, #tpu.memory_space<vmem>>, %arg2: memref<64x32xbf16, #tpu.memory_space<vmem>>, %arg3: memref<17x32xf32, #tpu.memory_space<vmem>>, %arg4: memref<2x17x32xf32, #tpu.memory_space<vmem>>) attributes {dimension_semantics = [#tpu.dimension_semantics<parallel>], iteration_bounds = array<i64: 2>, scalar_prefetch = 0 : i64, scratch_operands = 0 : i64, tpu.core_type = #tpu.core_type<tc>, window_params = [{transform_indices = @transform_0, window_bounds = array<i64: 2, 16, 64>}, {pipeline_mode = #tpu.pipeline_mode<synchronous>, transform_indices = @transform_1, window_bounds = array<i64: 64, 32>}, {pipeline_mode = #tpu.pipeline_mode<synchronous>, transform_indices = @transform_2, window_bounds = array<i64: 17, 32>}, {transform_indices = @transform_3, window_bounds = array<i64: 2, 17, 32>}]} {
    %c0 = arith.constant 0 : index
    %c0_0 = arith.constant 0 : index
    %c0_1 = arith.constant 0 : index
    %0 = vector.load %arg1[%c0, %c0_0, %c0_1] : memref<2x16x64xbf16, #tpu.memory_space<vmem>>, vector<2x16x64xbf16>
    %1 = vector.shape_cast %0 : vector<2x16x64xbf16> to vector<32x64xbf16>
    %c0_2 = arith.constant 0 : index
    %c0_3 = arith.constant 0 : index
    %2 = vector.load %arg2[%c0_2, %c0_3] : memref<64x32xbf16, #tpu.memory_space<vmem>>, vector<64x32xbf16>
    %cst = arith.constant dense<0.000000e+00> : vector<32x32xf32>
    %3 = tpu.matmul %1, %2, %cst {dimension_numbers = #tpu.dot_dimension_numbers<[1], [0], [0], [1], [0, 0, 1, 1], [], []>} : vector<32x64xbf16>, vector<64x32xbf16>, vector<32x32xf32> -> vector<32x32xf32>
    %4 = vector.shape_cast %3 : vector<32x32xf32> to vector<2x16x32xf32>
    %c1 = arith.constant 1 : index
    %c0_4 = arith.constant 0 : index
    %5 = vector.load %arg3[%c1, %c0_4] : memref<17x32xf32, #tpu.memory_space<vmem>>, vector<16x32xf32>
    %6 = vector.shape_cast %5 : vector<16x32xf32> to vector<1x16x32xf32>
    %7 = vector.broadcast %6 : vector<1x16x32xf32> to vector<2x16x32xf32>
    %8 = arith.addf %4, %7 : vector<2x16x32xf32>
    %c0_5 = arith.constant 0 : index
    %c1_6 = arith.constant 1 : index
    %c0_7 = arith.constant 0 : index
    %9 = vector.load %arg4[%c0_5, %c1_6, %c0_7] : memref<2x17x32xf32, #tpu.memory_space<vmem>>, vector<2x16x32xf32>
    tpu.vector_store %arg4[%c0_5, %c1_6, %c0_7], %8 {strides = array<i32>} : memref<2x17x32xf32, #tpu.memory_space<vmem>>, vector<2x16x32xf32>,
    %c0_8 = arith.constant 0 : index
    %c0_9 = arith.constant 0 : index
    %10 = vector.load %arg3[%c0_8, %c0_9] : memref<17x32xf32, #tpu.memory_space<vmem>>, vector<1x32xf32>
    %11 = vector.shape_cast %10 : vector<1x32xf32> to vector<1x1x32xf32>
    %12 = vector.broadcast %11 : vector<1x1x32xf32> to vector<2x1x32xf32>
    %c0_10 = arith.constant 0 : index
    %c0_11 = arith.constant 0 : index
    %c0_12 = arith.constant 0 : index
    %13 = vector.load %arg4[%c0_10, %c0_11, %c0_12] : memref<2x17x32xf32, #tpu.memory_space<vmem>>, vector<2x1x32xf32>
    tpu.vector_store %arg4[%c0_10, %c0_11, %c0_12], %12 {strides = array<i32>} : memref<2x17x32xf32, #tpu.memory_space<vmem>>, vector<2x1x32xf32>,
    return
  }
  func.func @transform_0(%arg0: i32) -> (i32, i32, i32) {
    %c0_i32 = arith.constant 0 : i32
    %c0_i32_0 = arith.constant 0 : i32
    %c0_i32_1 = arith.constant 0 : i32
    return %arg0, %c0_i32, %c0_i32_0 : i32, i32, i32
  }
  func.func @transform_1(%arg0: i32) -> (i32, i32) {
    %c0_i32 = arith.constant 0 : i32
    %c0_i32_0 = arith.constant 0 : i32
    %c0_i32_1 = arith.constant 0 : i32
    return %c0_i32, %c0_i32_0 : i32, i32
  }
  func.func @transform_2(%arg0: i32) -> (i32, i32) {
    %c0_i32 = arith.constant 0 : i32
    %c0_i32_0 = arith.constant 0 : i32
    %c0_i32_1 = arith.constant 0 : i32
    return %c0_i32, %c0_i32_0 : i32, i32
  }
  func.func @transform_3(%arg0: i32) -> (i32, i32, i32) {
    %c0_i32 = arith.constant 0 : i32
    %c0_i32_0 = arith.constant 0 : i32
    %c0_i32_1 = arith.constant 0 : i32
    return %arg0, %c0_i32, %c0_i32_0 : i32, i32, i32
  }
}

</mosaic_0001>

<bundles_post_ra>
// kernel: tpu_custom_call.1
= control target key start
LH: loop header
LB: loop body
LE: loop exit
PB: predicated region body
PF: predicated region fallthrough
CT: control target
= control target key end

     0   :  { %8 = vsyncpa [#allocation3], 0  ;;  %s514_s12 = smov 0   ;;  %s587_s0 = inlined_call_operand.vmem [shape: bf16[4,16,64], index: 0, kind: input, shape index: {}]   ;;  %s588_s1 = inlined_call_operand.vmem [shape: bf16[64,32], index: 1, kind: input, shape index: {}]   ;;  %s589_s2 = inlined_call_operand.hbm [shape: f32[17,32], index: 2, kind: input, shape index: {}]   ;;  %s590_s3 = inlined_call_operand.vmem [shape: f32[4,17,32], index: 3, kind: output, shape index: {}]  }
   0x1 LB: > { %s382_s13 = sadd.s32 4294967295, %s489_s12   ;;  %p384_p0 = scmp.ge.s32.totalorder %s489_s12, 1  ;;  %s489_s12 = sphi %s514_s12, %s14_s12  }
   0x2   : > { %p113_p1 = scmp.lt.s32.totalorder %s489_s12, 3  ;;  %s491_s14 = smov [#allocation2]  }
   0x3   : > { %s128_s15 = sshll.u32 %s491_s14, 4  ;;  %p528_p3 = scmp.eq.s32.totalorder %s382_s13, 0  ;;  %s129_s15 = int_to_ptr.vmem [resolvable:$true] %s128_s15 }
   0x4   : > { %p522_p2 = pnand %p384_p0, %p113_p1  ;;  %s451_s21 = scalar_lea.hbm %s589_s2, 384 }
   0x5   : > { %s595_s17 = scalar_select %p528_p3, 1, 0 }
   0x6   : > { %s594_s16 = scalar_select %p522_p2, 1, 0 }
   0x7   : > { %p428_p4 = pneg %p522_p2  ;;  %p452_p6 = scmp.ne.s32.totalorder %s589_s2, %s451_s21 }
   0x8   : > { %p458_p10 = scmp.lt.u32.totalorder %s451_s21, %s589_s2 }
   0x9   : > { %p536_p5 = pnand %p528_p3, %p428_p4 }
   0xb   : > { %p453_p7 = pneg %p536_p5 }
   0xd   : > { %p454_p8 = pnand %p453_p7, %p452_p6 }
   0xf   : > { %p455_p9 = pneg %p454_p8 }
  0x11   : > { %p460_p11 = pnand %p458_p10, %p455_p9 }
  0x13   : > { %463 = shalt.err (!%p460_p11)
}
  0x14   : > { %s464_s26 = scalar_lea.vmem %s129_s15, 384  ;;  %p472_p1 = scmp.lt.s32.totalorder %s129_s15, %s129_s15 }
  0x15   : > { %p465_p12 = scmp.ne.s32.totalorder %s129_s15, %s464_s26  ;;  %p473_p4 = scmp.lt.s32.totalorder %s464_s26, %s464_s26 }
  0x17   : > { %p467_p13 = pnand %p465_p12, %p453_p7  ;;  %p474_p3 = por %p473_p4, %p472_p1 }
  0x19   : > { %p468_p0 = pneg %p467_p13 }
  0x1b   : > { %p475_p2 = pnand %p474_p3, %p468_p0 }
  0x1d   : > { %478 = shalt.err (!%p475_p2)
}
  0x1e   : > { %s492_s27 = smov 128   ;;  %s493_s28 = smov 8  }
  0x1f   : > { %431 = dma.hbm_to_vmem [thread:$0]  (!%p536_p5), %s589_s2, 384, %s129_s15, [#allocation3], %s492_s27, %s492_s27, %s493_s28  }
  0x20   : > { %p597_p6 = scmp.ne.s32.totalorder %s594_s16, 0 }
  0x21   : > { %p598_p8 = scmp.ne.s32.totalorder (!%p597_p6), %s595_s17, 0 }
  0x22   : > { %154 = sbr.rel (%p597_p6) target bundleno = 277 (0x115), region = 32 }
  0x29   : > { %484 = dma.done.wait (%p598_p8), [#allocation3], 384  }
  0x2a   : > { %486 = vsyncadd (%p598_p8), [#allocation3], 4294966912  ;;  %s389_s4 = sshll.u32 %s382_s13, 1  ;;  %v445_v0 = vld [vmem:[%s588_s1] sm:$0xff]   ;;  %v446_v1 = vld [vmem:[%s588_s1 + $0x8] sm:$0xff]   ;;  %vm241_vm0 = vcmask 523264  }
  0x2b   : > { %p181_p2 = scmp.lt.s32.totalorder %s389_s4, 3  ;;  %411 = vmatprep.subr.bf16.mxu0 %v445_v0  ;;  %v447_v2 = vld [vmem:[%s588_s1 + $0x10] sm:$0xff]   ;;  %vm309_vm1 = vcmask 253952   ;;  %v308_v4 = vld [vmem:[#allocation2] sm:$0x1]  ;;  %v448_v5 = vld [vmem:[%s588_s1 + $0x18] sm:$0xff]  }
  0x2c   : > { %412 = vmatpush3.bf16.msra.mxu0 %v445_v0  ;;  %v297_v7 = vld [vmem:[#allocation2 + $0x1] sm:$0xff]  ;;  %vm303_vm2 = vcmask 261120   ;;  %v298_v10 = vld [vmem:[#allocation2 + $0x9] sm:$0xff] }
  0x2d   : > { %s600_s4 = smov (!%p181_p2, %s389_s4), 3  ;;  %413 = vmatprep.subr.bf16.mxu0 %v446_v1 }
  0x2e   : > { %s404_s5 = sshll.u32 %s600_s4, 3  ;;  %s423_s15 = smul.u32 24, %s600_s4 }
  0x2f   : > { %s185_s14 = scalar_lea.vmem %s587_s0, %s404_s5 }
  0x30   : > { %v449_v3 = vld [vmem:[%s185_s14] sm:$0xff]   ;;  %s192_s19 = scalar_lea.vmem %s590_s3, %s423_s15  ;;  %414 = vmatpush3.bf16.msra.mxu0 %v446_v1  ;;  %v450_v6 = vld [vmem:[%s185_s14 + $0x8] sm:$0xff]  }
  0x31   : > { %419 = vmatprep.mubr.msk.bf16.mxu0 %vm241_vm0, %v449_v3  ;;  %310 = vst.msk [vmem:[%s192_s19] sm:$0x1] %vm309_vm1, %v308_v4  ;;  %311 = vst.msk [vmem:[%s192_s19 + $0x18] sm:$0x1] %vm309_vm1, %v308_v4  ;;  %415 = vmatprep.subr.bf16.mxu0 %v447_v2 }
  0x34   : > { %416 = vmatpush3.bf16.msra.mxu0 %v447_v2 }
  0x35   : > { %417 = vmatprep.subr.bf16.mxu0 %v448_v5 }
  0x38   : > { %418 = vmatpush3.bf16.msra.mxu0 %v448_v5 }
  0x3b   : > { %420 = vmatmul.mubr.msk.bf16.vlgmr.msra.gmra.mrb[0].mxu0 %vm241_vm0, %v450_v6 }
 0x10e   : > { %v421_v8 = vpop.f32.mrb[0].mxu0 }
 0x10f   : > { %v282_v9 = vpop.f32.mrb[1].mxu0  ;;  %v301_v13 = vadd.f32 %v421_v8, %v297_v7 }
 0x110   : > { %v299_v11 = vadd.f32 %v297_v7, %v282_v9  ;;  %v422_v12 = vpop.f32.mrb[2].mxu0 }
 0x111   : > { %v285_v14 = vpop.f32.mrb[3].mxu0  ;;  %306 = vst.msk [vmem:[%s192_s19 + $0x19] sm:$0xff] %vm303_vm2, %v301_v13  ;;  %v302_v16 = vadd.f32 %v422_v12, %v298_v10 }
 0x112   : > { %304 = vst.msk [vmem:[%s192_s19 + $0x1] sm:$0xff] %vm303_vm2, %v299_v11  ;;  %v300_v15 = vadd.f32 %v298_v10, %v285_v14 }
 0x113   : > { %307 = vst.msk [vmem:[%s192_s19 + $0x21] sm:$0xff] %vm303_vm2, %v302_v16 }
 0x114   : > { %305 = vst.msk [vmem:[%s192_s19 + $0x9] sm:$0xff] %vm303_vm2, %v300_v15 }
 0x115 PF: > { %s14_s12 = sadd.s32 1, %s489_s12  }
 0x116   : > { %p11_p3 = scmp.ge.s32.totalorder %s14_s12, 4  }
 0x118   :  { %13 = sbr.rel (!%p11_p3) target bundleno = 1 (0x1), region = 67 }
 0x11f   :  { %336 = vsyncpa [#allocation3], 1 }
 0x120   :  { %338 = vsyncpa [#allocation3 + $0x1], 1 }

</bundles_post_ra>
